<compile_context>
chip_gen: v7x
topology: tpu7x:2x2x1
jax: 0.10.0
libtpu: 0.0.40
codegen_flags: <defaults>
</compile_context>

<pallas_src>
import functools

import numpy as np

import jax
import jax.numpy as jnp
from jax import lax
from jax.experimental import pallas as pl
from jax.experimental.pallas import tpu as pltpu

_EPS = 1e-8            # torch.nn.CosineSimilarity default eps (clamps |x|*|y|)
_SQRT_EPS = 1e-4       # per-vector clamp used in-kernel; identical to the torch
                       # product clamp except for pathological inputs where
                       # exactly one norm lies in (0, 1e-4).
_Y_RESIDENT_BYTES = 4 * 1024 * 1024      # hold all of y in VMEM below this size
_OPERAND_TILE_BYTES = 2 * 1024 * 1024    # per-buffer cap for a (tile, H) slab


def _round_up(n, m):
    return (n + m - 1) // m * m


def _similarity_kernel(x_ref, y_ref, xn_ref, yn_ref, o_ref, *, inv_temp, approx):
    # x_ref: (tm, H) bf16 | y_ref: (tn, H) bf16
    # xn_ref: (tm, 1) f32 | yn_ref: (1, tn) f32 | o_ref: (tm, tn)
    dots = lax.dot_general(
        x_ref[...],
        y_ref[...],
        dimension_numbers=(((1,), (1,)), ((), ())),   # contract on H (q @ k.T style)
        preferred_element_type=jnp.float32,
    )                                                 # (tm, tn), f32 MXU accumulation

    # tm + tn EUP reciprocals on the norm vectors instead of a full (tm, tn)
    # reciprocal tile; 1/temp is folded into the column factor.
    rx = pl.reciprocal(jnp.maximum(xn_ref[...], _SQRT_EPS), approx=approx)  # (tm, 1)
    ry = pl.reciprocal(jnp.maximum(yn_ref[...], _SQRT_EPS), approx=approx)  # (1, tn)
    o_ref[...] = (dots * (rx * (ry * inv_temp))).astype(o_ref.dtype)


def _pick_tile(b_pad, h, in_bytes, *, prefer_two_blocks):
    """Largest of {512, 256, 128} dividing b_pad whose (tile, H) slab stays under
    _OPERAND_TILE_BYTES per buffer. With prefer_two_blocks, also require >=2
    blocks (v7x megacore) unless only 128 remains."""
    for cand in (512, 256):
        if b_pad % cand:
            continue
        if cand * h * in_bytes > _OPERAND_TILE_BYTES:
            continue
        if prefer_two_blocks and b_pad // cand < 2:
            continue
        return cand
    return 128  # b_pad is always a multiple of 128


def similarity(x, y, temp, *, out_dtype=jnp.float32, approx_reciprocal=True):
    """Pallas equivalent of SimCSE `Similarity(temp)(x, y)`.

    x: (Bx, 1, H), y: (1, By, H)  ->  (Bx, By) = cos_sim(x_i, y_j) / temp.

    Notes:
      * `temp` must be a static Python scalar (it is folded into the kernel).
      * `out_dtype=jnp.bfloat16` halves output HBM traffic (recommended on the
        mem-bound v5e when the logits feed a bf16 loss).
      * `approx_reciprocal=True` uses the EUP approximate reciprocal
        (~1e-3 relative deviation from an exact divide); set False for exact.
    """
    if not isinstance(temp, (int, float)):
        raise TypeError(
            "temp must be a static Python scalar; it is folded into the kernel "
            f"at trace time (got {type(temp)}). Pass it via SMEM scalar "
            "prefetch instead if it must be traced/learnable.")
    inv_temp = 1.0 / float(temp)

    xb = jnp.squeeze(x, axis=1)   # (Bx, H)
    yb = jnp.squeeze(y, axis=0)   # (By, H)
    Bx, H = xb.shape
    By, Hy = yb.shape
    assert H == Hy, "hidden dims of x and y must match"

    # Pad batch dims to multiples of 128 (zero rows -> zero norm -> zero cosine,
    # sliced away at the end).
    Bx_pad = _round_up(Bx, 128)
    By_pad = _round_up(By, 128)
    if Bx_pad != Bx:
        xb = jnp.pad(xb, ((0, Bx_pad - Bx), (0, 0)))
    if By_pad != By:
        yb = jnp.pad(yb, ((0, By_pad - By), (0, 0)))

    # Row norms hoisted out of the (i, j) tile loop, computed once in f32.
    # TODO(synk): for tiny launch-latency-bound batches, fuse yn into the kernel
    # per j step and xn under @pl.when(j == 0) with a (tm,1) scratch instead.
    xf = xb.astype(jnp.float32)
    yf = yb.astype(jnp.float32)
    xn = jnp.sqrt(jnp.sum(xf * xf, axis=-1, keepdims=True))      # (Bx_pad, 1)
    yn = jnp.sqrt(jnp.sum(yf * yf, axis=-1, keepdims=True)).T    # (1, By_pad)

    # Cosine similarity is scale invariant: bf16 operands + f32 accumulation is
    # numerically safe, guarantees the native bf16 MXU path and halves input DMA.
    xb = xb.astype(jnp.bfloat16)
    yb = yb.astype(jnp.bfloat16)
    in_bytes = 2

    # Tile selection.
    y_resident = (By_pad * H * in_bytes <= _Y_RESIDENT_BYTES) and (By_pad <= 2048)
    if y_resident:
        # y is fetched exactly once (its block index never changes); keep tm
        # modest so grid axis 0 has >=2 blocks when possible (v7x megacore).
        tn = By_pad
        tm = _pick_tile(Bx_pad, H, in_bytes, prefer_two_blocks=True)
    else:
        # Tiled y: enlarge tm to cut the number of full passes over y.
        tm = _pick_tile(Bx_pad, H, in_bytes, prefer_two_blocks=False)
        tn = 256 if (By_pad % 256 == 0 and
                     256 * H * in_bytes <= _OPERAND_TILE_BYTES) else 128
    grid = (Bx_pad // tm, By_pad // tn)

    # Scoped-VMEM request = actual footprint (double-buffered operands + output
    # + norm vectors) with headroom — never the whole physical VMEM.
    out_bytes = np.dtype(out_dtype).itemsize
    est = (2 * (tm + tn) * H * in_bytes        # x / y tiles, double-buffered
           + 2 * tm * tn * out_bytes           # output tile, double-buffered
           + 4 * (tm + tn) * 4)                # norm tiles
    vmem_limit = min(max(int(est * 1.5) + (1 << 20), 16 * 1024 * 1024),
                     40 * 1024 * 1024)
    # TODO(synk): for very large H (operand slabs >~8 MiB even at 128-tiles),
    # add a K grid axis with a (tm, tn) f32 VMEM accumulator instead of
    # widening the VMEM request further (v7x has only 64 MiB per TensorCore).

    kernel = functools.partial(
        _similarity_kernel, inv_temp=inv_temp, approx=bool(approx_reciprocal))

    out = pl.pallas_call(
        kernel,
        out_shape=jax.ShapeDtypeStruct((Bx_pad, By_pad), out_dtype),
        grid_spec=pltpu.PrefetchScalarGridSpec(
            num_scalar_prefetch=0,
            grid=grid,
            in_specs=[
                pl.BlockSpec((tm, H), lambda i, j: (i, 0)),
                pl.BlockSpec((tn, H), lambda i, j: (j, 0)),
                pl.BlockSpec((tm, 1), lambda i, j: (i, 0)),
                pl.BlockSpec((1, tn), lambda i, j: (0, j)),
            ],
            out_specs=pl.BlockSpec((tm, tn), lambda i, j: (i, j)),
        ),
        compiler_params=pltpu.CompilerParams(
            dimension_semantics=("parallel", "parallel"),
            vmem_limit_bytes=vmem_limit,
        ),
    )(xb, yb, xn, yn)

    if Bx_pad != Bx or By_pad != By:
        out = out[:Bx, :By]
    return out


def _reference(x, y, temp):
    xb = jnp.squeeze(x, 1).astype(jnp.float32)
    yb = jnp.squeeze(y, 0).astype(jnp.float32)
    dots = xb @ yb.T
    denom = jnp.maximum(
        jnp.linalg.norm(xb, axis=-1, keepdims=True)
        * jnp.linalg.norm(yb, axis=-1, keepdims=True).T,
        _EPS,
    )
    return (dots / denom) / temp


if __name__ == "__main__":
    key = jax.random.PRNGKey(0)
    temp = 0.05  # SimCSE default temperature

    def run_case(B, H, k1, k2):
        x = jax.random.normal(k1, (B, 1, H), dtype=jnp.float32)
        y = jax.random.normal(k2, (1, B, H), dtype=jnp.float32)
        out = jax.block_until_ready(similarity(x, y, temp))
        ref = _reference(x, y, temp)
        assert out.shape == (B, B), (out.shape, B)
        ok = bool(jnp.allclose(out, ref, atol=5e-2, rtol=1e-2))
        assert ok, (
            f"mismatch at B={B}, H={H}: "
            f"max|diff|={float(jnp.max(jnp.abs(out - ref)))}")

    ks = jax.random.split(key, 8)
    run_case(8, 32, ks[0], ks[1])       # tiny SimCSE-style batch: padded, grid (1, 1)
    run_case(200, 48, ks[2], ks[3])     # ragged batch: padded to 256, grid (2, 1)
    run_case(384, 64, ks[4], ks[5])     # aligned multi-block, resident-y path
    run_case(2304, 64, ks[6], ks[7])    # By_pad > 2048 -> tiled-y path, grid (9, 9)
    print("KERNEL_OK")
</pallas_src>

<mosaic_0001>
module attributes {stable_mosaic.version = 11 : i64} {
  func.func @_similarity_kernel(%arg0: i32, %arg1: i32, %arg2: memref<128x32xbf16, #tpu.memory_space<vmem>>, %arg3: memref<128x32xbf16, #tpu.memory_space<vmem>>, %arg4: memref<128x1xf32, #tpu.memory_space<vmem>>, %arg5: memref<1x128xf32, #tpu.memory_space<vmem>>, %arg6: memref<128x128xf32, #tpu.memory_space<vmem>>) attributes {dimension_semantics = [#tpu.dimension_semantics<parallel>, #tpu.dimension_semantics<parallel>], iteration_bounds = array<i64: 1, 1>, scalar_prefetch = 0 : i64, scratch_operands = 0 : i64, tpu.core_type = #tpu.core_type<tc>, window_params = [{transform_indices = @transform_0, window_bounds = array<i64: 128, 32>}, {transform_indices = @transform_1, window_bounds = array<i64: 128, 32>}, {transform_indices = @transform_2, window_bounds = array<i64: 128, 1>}, {transform_indices = @transform_3, window_bounds = array<i64: 1, 128>}, {transform_indices = @transform_4, window_bounds = array<i64: 128, 128>}]} {
    %c0 = arith.constant 0 : index
    %c0_0 = arith.constant 0 : index
    %0 = vector.load %arg2[%c0, %c0_0] : memref<128x32xbf16, #tpu.memory_space<vmem>>, vector<128x32xbf16>
    %c0_1 = arith.constant 0 : index
    %c0_2 = arith.constant 0 : index
    %1 = vector.load %arg3[%c0_1, %c0_2] : memref<128x32xbf16, #tpu.memory_space<vmem>>, vector<128x32xbf16>
    %cst = arith.constant dense<0.000000e+00> : vector<128x128xf32>
    %2 = tpu.matmul %0, %1, %cst {dimension_numbers = #tpu.dot_dimension_numbers<[1], [1], [0], [0], [0, 0, 1, 0], [], []>} : vector<128x32xbf16>, vector<128x32xbf16>, vector<128x128xf32> -> vector<128x128xf32>
    %c0_3 = arith.constant 0 : index
    %c0_4 = arith.constant 0 : index
    %3 = vector.load %arg4[%c0_3, %c0_4] : memref<128x1xf32, #tpu.memory_space<vmem>>, vector<128x1xf32>
    %cst_5 = arith.constant 9.99999974E-5 : f32
    %4 = vector.broadcast %cst_5 : f32 to vector<128x1xf32>
    %5 = arith.maximumf %3, %4 : vector<128x1xf32>
    %6 = tpu.reciprocal %5 {approx = true} : vector<128x1xf32> -> vector<128x1xf32>
    %c0_6 = arith.constant 0 : index
    %c0_7 = arith.constant 0 : index
    %7 = vector.load %arg5[%c0_6, %c0_7] : memref<1x128xf32, #tpu.memory_space<vmem>>, vector<1x128xf32>
    %cst_8 = arith.constant 9.99999974E-5 : f32
    %8 = vector.broadcast %cst_8 : f32 to vector<1x128xf32>
    %9 = arith.maximumf %7, %8 : vector<1x128xf32>
    %10 = tpu.reciprocal %9 {approx = true} : vector<1x128xf32> -> vector<1x128xf32>
    %cst_9 = arith.constant 2.000000e+01 : f32
    %11 = vector.broadcast %cst_9 : f32 to vector<1x128xf32>
    %12 = arith.mulf %10, %11 : vector<1x128xf32>
    %13 = vector.broadcast %6 : vector<128x1xf32> to vector<128x128xf32>
    %14 = vector.broadcast %12 : vector<1x128xf32> to vector<128x128xf32>
    %15 = arith.mulf %13, %14 : vector<128x128xf32>
    %16 = arith.mulf %2, %15 : vector<128x128xf32>
    %c0_10 = arith.constant 0 : index
    %c0_11 = arith.constant 0 : index
    %17 = vector.load %arg6[%c0_10, %c0_11] : memref<128x128xf32, #tpu.memory_space<vmem>>, vector<128x128xf32>
    tpu.vector_store %arg6[%c0_10, %c0_11], %16 {strides = array<i32>} : memref<128x128xf32, #tpu.memory_space<vmem>>, vector<128x128xf32>,
    return
  }
  func.func @transform_0(%arg0: i32, %arg1: i32) -> (i32, i32) {
    %c0_i32 = arith.constant 0 : i32
    %c0_i32_0 = arith.constant 0 : i32
    return %arg0, %c0_i32 : i32, i32
  }
  func.func @transform_1(%arg0: i32, %arg1: i32) -> (i32, i32) {
    %c0_i32 = arith.constant 0 : i32
    %c0_i32_0 = arith.constant 0 : i32
    return %arg1, %c0_i32 : i32, i32
  }
  func.func @transform_2(%arg0: i32, %arg1: i32) -> (i32, i32) {
    %c0_i32 = arith.constant 0 : i32
    %c0_i32_0 = arith.constant 0 : i32
    return %arg0, %c0_i32 : i32, i32
  }
  func.func @transform_3(%arg0: i32, %arg1: i32) -> (i32, i32) {
    %c0_i32 = arith.constant 0 : i32
    %c0_i32_0 = arith.constant 0 : i32
    return %c0_i32, %arg1 : i32, i32
  }
  func.func @transform_4(%arg0: i32, %arg1: i32) -> (i32, i32) {
    %c0_i32 = arith.constant 0 : i32
    return %arg0, %arg1 : i32, i32
  }
}

</mosaic_0001>

<bundles_post_ra>
// kernel: tpu_custom_call.1
= control target key start
LH: loop header
LB: loop body
LE: loop exit
PB: predicated region body
PF: predicated region fallthrough
CT: control target
= control target key end

     0   :  { %vm131_vm0 = vcmask 261120   ;;  %v663_v3 = vmov 0   ;;  %s838_s0 = inlined_call_operand.vmem [shape: bf16[128,32], index: 0, kind: input, shape index: {}]   ;;  %s839_s1 = inlined_call_operand.vmem [shape: bf16[128,32], index: 1, kind: input, shape index: {}]   ;;  %s840_s2 = inlined_call_operand.vmem [shape: f32[128,1], index: 2, kind: input, shape index: {}]   ;;  %s841_s3 = inlined_call_operand.vmem [shape: f32[1,128], index: 3, kind: input, shape index: {}]   ;;  %s842_s4 = inlined_call_operand.hbm [shape: f32[128,128], index: 4, kind: output, shape index: {}]  }
   0x1   :  { %v589_v0 = vld [vmem:[%s839_s1] sm:$0xff]   ;;  %v590_v1 = vld [vmem:[%s839_s1 + $0x8] sm:$0xff]   ;;  %588 = vset.pattern.permute.xlu1 %v663_v3  ;;  %587 = vset.pattern.permute.xlu0 %v663_v3  ;;  %v591_v4 = vld [vmem:[%s839_s1 + $0x10] sm:$0xff]  }
   0x2   :  { %567 = vmatprep.subr.msk.bf16.mxu0 %vm131_vm0, %v589_v0  ;;  %568 = vmatprep.subr.msk.bf16.mxu1 %vm131_vm0, %v589_v0  ;;  %v157_v2 = vsel %vm131_vm0, %v589_v0, 0  ;;  %v160_v5 = vsel %vm131_vm0, %v590_v1, 0  ;;  %v597_v6 = vld [vmem:[%s838_s0] sm:$0xff]   ;;  %v592_v8 = vld [vmem:[%s839_s1 + $0x18] sm:$0xff]   ;;  %v163_v9 = vsel %vm131_vm0, %v591_v4, 0  ;;  %v279_v10 = vld [vmem:[%s840_s2 + $0x10] sm:$0xff] }
   0x3   :  { %520 = vmatpush3.bf16.xpose.msra.mxu0 %v157_v2  ;;  %559 = vmatpush3.bf16.xpose.msra.mxu1 %v157_v2  ;;  %v598_v7 = vld [vmem:[%s838_s0 + $0x20] sm:$0xff]   ;;  %v280_v12 = vld [vmem:[%s840_s2 + $0x18] sm:$0xff]  ;;  %v295_v13 = vmax.f32 %v279_v10, 0.0001  ;;  %v278_v16 = vld [vmem:[%s840_s2 + $0x8] sm:$0xff]  ;;  %v166_v22 = vsel %vm131_vm0, %v592_v8, 0 }
   0x4   :  { %569 = vmatprep.subr.msk.bf16.mxu0 %vm131_vm0, %v590_v1  ;;  %570 = vmatprep.subr.msk.bf16.mxu1 %vm131_vm0, %v590_v1  ;;  %v277_v11 = vld [vmem:[%s840_s2] sm:$0xff]  ;;  %v296_v15 = vmax.f32 %v280_v12, 0.0001  ;;  %v282_v17 = vld [vmem:[%s840_s2 + $0x28] sm:$0xff]  ;;  %v294_v18 = vmax.f32 %v278_v16, 0.0001 }
   0x5   :  { %535 = vmatprep.mubr.msk.bf16.mxu0 %vm131_vm0, %v597_v6  ;;  %543 = vmatprep.mubr.msk.bf16.mxu1 %vm131_vm0, %v598_v7  ;;  %v293_v14 = vmax.f32 %v277_v11, 0.0001  ;;  %605 = vrcp.f32 %v295_v13  ;;  %v298_v19 = vmax.f32 %v282_v17, 0.0001  ;;  %v281_v20 = vld [vmem:[%s840_s2 + $0x20] sm:$0xff]  ;;  %v284_v21 = vld [vmem:[%s840_s2 + $0x38] sm:$0xff] }
   0x6   :  { %v593_v23 = vld [vmem:[%s839_s1 + $0x20] sm:$0xff]   ;;  %v297_v24 = vmax.f32 %v281_v20, 0.0001  ;;  %v300_v25 = vmax.f32 %v284_v21, 0.0001  ;;  %v283_v26 = vld [vmem:[%s840_s2 + $0x30] sm:$0xff] }
   0x7   :  { %607 = vrcp.f32 %v293_v14  ;;  %v286_v27 = vld [vmem:[%s840_s2 + $0x48] sm:$0xff] }
   0x8   :  { %609 = vrcp.f32 %v296_v15 }
   0x9   :  { %611 = vrcp.f32 %v294_v18 }
   0xa   :  { %613 = vrcp.f32 %v298_v19 }
   0xb   :  { %522 = vmatpush3.bf16.xpose.msra.mxu0 %v160_v5  ;;  %560 = vmatpush3.bf16.xpose.msra.mxu1 %v160_v5 }
   0xc   :  { %571 = vmatprep.subr.msk.bf16.mxu0 %vm131_vm0, %v591_v4  ;;  %572 = vmatprep.subr.msk.bf16.mxu1 %vm131_vm0, %v591_v4 }
  0x13   :  { %524 = vmatpush3.bf16.xpose.msra.mxu0 %v163_v9  ;;  %561 = vmatpush3.bf16.xpose.msra.mxu1 %v163_v9 }
  0x14   :  { %573 = vmatprep.subr.msk.bf16.mxu0 %vm131_vm0, %v592_v8  ;;  %574 = vmatprep.subr.msk.bf16.mxu1 %vm131_vm0, %v592_v8 }
  0x15   :  { %9 = vsyncpa [#allocation3], 0  ;;  %615 = vrcp.f32 %v297_v24  ;;  %v299_v28 = vmax.f32 %v283_v26, 0.0001  ;;  %v606_v29 = vpop.eup %605  ;;  %v302_v30 = vmax.f32 %v286_v27, 0.0001  ;;  %v410_v19 = vlaneseq }
  0x16   :  { %617 = vrcp.f32 %v300_v25  ;;  %v285_v31 = vld [vmem:[%s840_s2 + $0x40] sm:$0xff]  ;;  %v608_v32 = vpop.eup %607  ;;  %341 = vperm.xlu1 %588, %v606_v29   ;;  %v288_v33 = vld [vmem:[%s840_s2 + $0x58] sm:$0xff]  ;;  %v169_v35 = vsel %vm131_vm0, %v593_v23, 0  ;;  %v594_v36 = vld [vmem:[%s839_s1 + $0x28] sm:$0xff]  }
  0x17   :  { %v610_v34 = vpop.eup %609  ;;  %331 = vperm.xlu0 %587, %v608_v32   ;;  %619 = vrcp.f32 %v299_v28  ;;  %v301_v37 = vmax.f32 %v285_v31, 0.0001  ;;  %v304_v38 = vmax.f32 %v288_v33, 0.0001  ;;  %v287_v39 = vld [vmem:[%s840_s2 + $0x50] sm:$0xff]  ;;  %v290_v41 = vld [vmem:[%s840_s2 + $0x68] sm:$0xff] }
  0x18   :  { %621 = vrcp.f32 %v302_v30  ;;  %v612_v40 = vpop.eup %611  ;;  %v303_v43 = vmax.f32 %v287_v39, 0.0001  ;;  %v306_v44 = vmax.f32 %v290_v41, 0.0001  ;;  %v289_v45 = vld [vmem:[%s840_s2 + $0x60] sm:$0xff]  ;;  %v292_v47 = vld [vmem:[%s840_s2 + $0x78] sm:$0xff] }
  0x19   :  { %v614_v42 = vpop.eup %613  ;;  %623 = vrcp.f32 %v301_v37  ;;  %v172_v49 = vsel %vm131_vm0, %v594_v36, 0  ;;  %v595_v50 = vld [vmem:[%s839_s1 + $0x30] sm:$0xff]   ;;  %v305_v51 = vmax.f32 %v289_v45, 0.0001  ;;  %v308_v52 = vmax.f32 %v292_v47, 0.0001 }
  0x1a   :  { %346 = vperm.xlu1 %588, %v610_v34   ;;  %625 = vrcp.f32 %v304_v38  ;;  %v291_v53 = vld [vmem:[%s840_s2 + $0x70] sm:$0xff]  ;;  %v175_v59 = vsel %vm131_vm0, %v595_v50, 0  ;;  %v596_v60 = vld [vmem:[%s839_s1 + $0x38] sm:$0xff]   ;;  %v599_v3 = vld [vmem:[%s838_s0 + $0x8] sm:$0xff]   ;;  %v411_v21 = vshrl.u32 %v410_v19, 7 }
  0x1b   :  { %526 = vmatpush3.bf16.xpose.msra.mxu0 %v166_v22  ;;  %562 = vmatpush3.bf16.xpose.msra.mxu1 %v166_v22  ;;  %627 = vrcp.f32 %v303_v43  ;;  %v307_v56 = vmax.f32 %v291_v53, 0.0001  ;;  %v178_v1 = vsel %vm131_vm0, %v596_v60, 0  ;;  %v600_v4 = vld [vmem:[%s838_s0 + $0x28] sm:$0xff]   ;;  %v601_v5 = vld [vmem:[%s838_s0 + $0x10] sm:$0xff]   ;;  %v603_v7 = vld [vmem:[%s838_s0 + $0x18] sm:$0xff]  }
  0x1c   :  { %575 = vmatprep.subr.msk.bf16.mxu0 %vm131_vm0, %v593_v23  ;;  %576 = vmatprep.subr.msk.bf16.mxu1 %vm131_vm0, %v593_v23  ;;  %629 = vrcp.f32 %v306_v44  ;;  %v602_v6 = vld [vmem:[%s838_s0 + $0x30] sm:$0xff]   ;;  %v604_v8 = vld [vmem:[%s838_s0 + $0x38] sm:$0xff]   ;;  %v325_v13 = vld [vmem:[%s841_s3] sm:$0x1]  ;;  %v412_v25 = vsub.s32 0, %v411_v21  ;;  %s664_s0 = smov [#allocation2]  }
  0x1d   :  { %336 = vperm.xlu0 %587, %v612_v40   ;;  %631 = vrcp.f32 %v305_v51  ;;  %v326_v14 = vmax.f32 %v325_v13, 0.0001  ;;  %s468_s3 = sshll.u32 %s664_s0, 4  ;;  %s469_s3 = int_to_ptr.vmem [resolvable:$true] %s468_s3 }
  0x1e   :  { %356 = vperm.xlu1 %588, %v614_v42   ;;  %633 = vrcp.f32 %v308_v52  ;;  %s639_s27 = scalar_lea.vmem %s469_s3, 2048  ;;  %p644_p1 = scmp.lt.s32.totalorder %s469_s3, %s469_s3 }
  0x1f   :  { %v616_v46 = vpop.eup %615  ;;  %635 = vrcp.f32 %v307_v56  ;;  %p640_p0 = scmp.ne.s32.totalorder %s469_s3, %s639_s27  ;;  %p645_p2 = scmp.lt.s32.totalorder %s639_s27, %s639_s27 }
  0x20   :  { %v618_v48 = vpop.eup %617  ;;  %637 = vrcp.f32 %v326_v14 }
  0x21   :  { %351 = vperm.xlu0 %587, %v616_v46   ;;  %v620_v54 = vpop.eup %619  ;;  %p646_p3 = por %p645_p2, %p644_p1 }
  0x22   :  { %366 = vperm.xlu1 %588, %v618_v48   ;;  %v622_v55 = vpop.eup %621 }
  0x23   :  { %528 = vmatpush3.bf16.xpose.msra.mxu0 %v169_v35  ;;  %563 = vmatpush3.bf16.xpose.msra.mxu1 %v169_v35  ;;  %v624_v57 = vpop.eup %623  ;;  %p647_p4 = pnand %p646_p3, %p640_p0 }
  0x24   :  { %577 = vmatprep.subr.msk.bf16.mxu0 %vm131_vm0, %v594_v36  ;;  %578 = vmatprep.subr.msk.bf16.mxu1 %vm131_vm0, %v594_v36  ;;  %v626_v58 = vpop.eup %625 }
  0x25   :  { %361 = vperm.xlu0 %587, %v620_v54   ;;  %v628_v61 = vpop.eup %627 }
  0x26   :  { %376 = vperm.xlu1 %588, %v622_v55   ;;  %v630_v62 = vpop.eup %629 }
  0x27   :  { %v632_v63 = vpop.eup %631 }
  0x28   :  { %v634_v0 = vpop.eup %633 }
  0x29   :  { %371 = vperm.xlu0 %587, %v624_v57   ;;  %v636_v2 = vpop.eup %635 }
  0x2a   :  { %386 = vperm.xlu1 %588, %v626_v58   ;;  %v638_v23 = vpop.eup %637 }
  0x2b   :  { %530 = vmatpush3.bf16.xpose.msra.mxu0 %v172_v49  ;;  %564 = vmatpush3.bf16.xpose.msra.mxu1 %v172_v49  ;;  %v328_v24 = vmul.f32 20.0, %v638_v23 }
  0x2c   :  { %579 = vmatprep.subr.msk.bf16.mxu0 %vm131_vm0, %v595_v50  ;;  %580 = vmatprep.subr.msk.bf16.mxu1 %vm131_vm0, %v595_v50 }
  0x2d   :  { %381 = vperm.xlu0 %587, %v628_v61   ;;  %v413_v28 = vrot.slane %v328_v24, %v412_v25 }
  0x2e   :  { %396 = vperm.xlu1 %588, %v630_v62  }
  0x31   :  { %391 = vperm.xlu0 %587, %v632_v63  }
  0x32   :  { %406 = vperm.xlu1 %588, %v634_v0  }
  0x33   :  { %532 = vmatpush3.bf16.xpose.msra.mxu0 %v175_v59  ;;  %565 = vmatpush3.bf16.xpose.msra.mxu1 %v175_v59 }
  0x34   :  { %581 = vmatprep.subr.msk.bf16.mxu0 %vm131_vm0, %v596_v60  ;;  %582 = vmatprep.subr.msk.bf16.mxu1 %vm131_vm0, %v596_v60 }
  0x35   :  { %401 = vperm.xlu0 %587, %v636_v2  }
  0x3b   :  { %534 = vmatpush3.bf16.xpose.msra.mxu0 %v178_v1  ;;  %566 = vmatpush3.bf16.xpose.msra.mxu1 %v178_v1 }
  0x42   :  { %536 = vmatmul.mubr.msk.bf16.vlgmr.msra.gmra.mrb[0].mxu0 %vm131_vm0, %v599_v3  ;;  %544 = vmatmul.mubr.msk.bf16.vlgmr.msra.gmra.mrb[0].mxu1 %vm131_vm0, %v600_v4 }
  0x43   :  { %539 = vmatprep.mubr.msk.bf16.mxu0 %vm131_vm0, %v601_v5  ;;  %547 = vmatprep.mubr.msk.bf16.mxu1 %vm131_vm0, %v602_v6 }
  0x4a   :  { %540 = vmatmul.mubr.msk.bf16.gmra.mrb[4].mxu0 %vm131_vm0, %v603_v7  ;;  %548 = vmatmul.mubr.msk.bf16.gmra.mrb[4].mxu1 %vm131_vm0, %v604_v8 }
  0x95   :  { %v342_v10 = vpop.permute.xlu1 %341 }
  0x96   :  { %v332_v9 = vpop.permute.xlu0 %331  ;;  %v417_v30 = vmul.f32 %v413_v28, %v342_v10 }
  0x97   :  { %v415_v33 = vmul.f32 %v413_v28, %v332_v9 }
  0x99   :  { %v347_v12 = vpop.permute.xlu1 %346 }
  0x9a   :  { %v418_v37 = vmul.f32 %v413_v28, %v347_v12 }
  0x9c   :  { %v337_v11 = vpop.permute.xlu0 %336 }
  0x9d   :  { %v823_v16 = vpop.permute.xlu1 %356  ;;  %v416_v43 = vmul.f32 %v413_v28, %v337_v11 }
  0x9e   :  { %v420_v5 = vmul.f32 %v413_v28, %v823_v16 }
  0xa0   :  { %v352_v15 = vpop.permute.xlu0 %351 }
  0xa1   :  { %v367_v18 = vpop.permute.xlu1 %366  ;;  %v419_v59 = vmul.f32 %v413_v28, %v352_v15 }
  0xa2   :  { %v422_v63 = vmul.f32 %v413_v28, %v367_v18 }
  0xa4   :  { %v362_v17 = vpop.permute.xlu0 %361 }
  0xa5   :  { %v377_v22 = vpop.permute.xlu1 %376  ;;  %v421_v57 = vmul.f32 %v413_v28, %v362_v17 }
  0xa6   :  { %v424_v44 = vmul.f32 %v413_v28, %v377_v22 }
  0xa8   :  { %v372_v20 = vpop.permute.xlu0 %371 }
  0xa9   :  { %v387_v27 = vpop.permute.xlu1 %386  ;;  %v423_v34 = vmul.f32 %v413_v28, %v372_v20 }
  0xaa   :  { %v426_v38 = vmul.f32 %v413_v28, %v387_v27 }
  0xac   :  { %v382_v26 = vpop.permute.xlu0 %381 }
  0xad   :  { %v425_v31 = vmul.f32 %v413_v28, %v382_v26  ;;  %v397_v32 = vpop.permute.xlu1 %396 }
  0xae   :  { %v428_v6 = vmul.f32 %v413_v28, %v397_v32 }
  0xb0   :  { %v392_v29 = vpop.permute.xlu0 %391 }
  0xb1   :  { %v407_v56 = vpop.permute.xlu1 %406  ;;  %v427_v60 = vmul.f32 %v413_v28, %v392_v29 }
  0xb2   :  { %v430_v0 = vmul.f32 %v413_v28, %v407_v56 }
  0xb4   :  { %v402_v53 = vpop.permute.xlu0 %401 }
  0xb5   :  { %v429_v58 = vmul.f32 %v413_v28, %v402_v53 }
 0x115   :  { %v537_v35 = vpop.f32.mrb[0].mxu0  ;;  %v545_v36 = vpop.f32.mrb[0].mxu1 }
 0x116   :  { %v433_v39 = vmul.f32 %v537_v35, %v417_v30  ;;  %v441_v40 = vmul.f32 %v545_v36, %v425_v31  ;;  %v214_v41 = vpop.f32.mrb[1].mxu0  ;;  %v246_v42 = vpop.f32.mrb[1].mxu1 }
 0x117   :  { %v431_v45 = vmul.f32 %v415_v33, %v214_v41  ;;  %v439_v46 = vmul.f32 %v423_v34, %v246_v42  ;;  %v538_v47 = vpop.f32.mrb[2].mxu0  ;;  %v546_v48 = vpop.f32.mrb[2].mxu1 }
 0x118   :  { %449 = vst [vmem:[#allocation2 + $0x10] sm:$0xff] %v433_v39  ;;  %457 = vst [vmem:[#allocation2 + $0x50] sm:$0xff] %v441_v40  ;;  %v434_v49 = vmul.f32 %v538_v47, %v418_v37  ;;  %v442_v50 = vmul.f32 %v546_v48, %v426_v38  ;;  %v217_v51 = vpop.f32.mrb[3].mxu0  ;;  %v249_v52 = vpop.f32.mrb[3].mxu1 }
 0x119   :  { %447 = vst [vmem:[#allocation2] sm:$0xff] %v431_v45  ;;  %455 = vst [vmem:[#allocation2 + $0x40] sm:$0xff] %v439_v46  ;;  %v432_v54 = vmul.f32 %v416_v43, %v217_v51  ;;  %v440_v55 = vmul.f32 %v424_v44, %v249_v52 }
 0x11a   :  { %450 = vst [vmem:[#allocation2 + $0x18] sm:$0xff] %v434_v49  ;;  %458 = vst [vmem:[#allocation2 + $0x58] sm:$0xff] %v442_v50 }
 0x11b   :  { %448 = vst [vmem:[#allocation2 + $0x8] sm:$0xff] %v432_v54  ;;  %456 = vst [vmem:[#allocation2 + $0x48] sm:$0xff] %v440_v55 }
 0x11d   :  { %v541_v61 = vpop.f32.mrb[4].mxu0  ;;  %v549_v62 = vpop.f32.mrb[4].mxu1 }
 0x11e   :  { %v437_v1 = vmul.f32 %v541_v61, %v421_v57  ;;  %v445_v2 = vmul.f32 %v549_v62, %v429_v58  ;;  %v230_v3 = vpop.f32.mrb[5].mxu0  ;;  %v262_v4 = vpop.f32.mrb[5].mxu1 }
 0x11f   :  { %v435_v7 = vmul.f32 %v419_v59, %v230_v3  ;;  %v443_v8 = vmul.f32 %v427_v60, %v262_v4  ;;  %v542_v9 = vpop.f32.mrb[6].mxu0  ;;  %v550_v10 = vpop.f32.mrb[6].mxu1 }
 0x120   :  { %453 = vst [vmem:[#allocation2 + $0x30] sm:$0xff] %v437_v1  ;;  %461 = vst [vmem:[#allocation2 + $0x70] sm:$0xff] %v445_v2  ;;  %v438_v11 = vmul.f32 %v542_v9, %v422_v63  ;;  %v446_v12 = vmul.f32 %v550_v10, %v430_v0  ;;  %v233_v13 = vpop.f32.mrb[7].mxu0  ;;  %v265_v14 = vpop.f32.mrb[7].mxu1 }
 0x121   :  { %451 = vst [vmem:[#allocation2 + $0x20] sm:$0xff] %v435_v7  ;;  %459 = vst [vmem:[#allocation2 + $0x60] sm:$0xff] %v443_v8  ;;  %v436_v15 = vmul.f32 %v420_v5, %v233_v13  ;;  %v444_v17 = vmul.f32 %v428_v6, %v265_v14 }
 0x122   :  { %454 = vst [vmem:[#allocation2 + $0x38] sm:$0xff] %v438_v11  ;;  %462 = vst [vmem:[#allocation2 + $0x78] sm:$0xff] %v446_v12 }
 0x123   :  { %452 = vst [vmem:[#allocation2 + $0x28] sm:$0xff] %v436_v15  ;;  %460 = vst [vmem:[#allocation2 + $0x68] sm:$0xff] %v444_v17 }
 0x124   :  { %650 = shalt.err (!%p647_p4)
}
 0x125   :  { %s651_s30 = scalar_lea.hbm %s842_s4, 2048 }
 0x126   :  { %p652_p5 = scmp.ne.s32.totalorder %s842_s4, %s651_s30  ;;  %p655_p6 = scmp.lt.u32.totalorder %s651_s30, %s842_s4 }
 0x128   :  { %p657_p7 = pnand %p655_p6, %p652_p5 }
 0x12a   :  { %660 = shalt.err (!%p657_p7)
}
 0x12b   :  { %s665_s9 = smov 128   ;;  %s666_s10 = smov 8  }
 0x12c   :  { %474 = dma.vmem_to_hbm [thread:$0]  %s469_s3, 2048, %s842_s4, [#allocation3], %s665_s9, %s665_s9, %s666_s10  }
 0x12d   :  { %661 = dma.done.wait [#allocation3], 2048  }
 0x12e   :  { %662 = vsyncadd [#allocation3], 4294965248 }
 0x12f   :  { %478 = vsyncpa [#allocation3], 1 }

</bundles_post_ra>
